<compile_context>
chip_gen: v6e
topology: v6e:2x2x1
jax: 0.10.0
libtpu: 0.0.40
codegen_flags: <defaults>
</compile_context>

<pallas_src>
import functools

import jax
import jax.numpy as jnp
from jax.experimental import pallas as pl
from jax.experimental.pallas import tpu as pltpu


def _round_up(n, m):
    return pl.cdiv(n, m) * m


def _mlp_kernel(x_ref, w1_ref, b1_ref, w2_ref, b2_ref, o_ref):
    # Fused: two matmuls + bias + LeakyReLU; hidden never leaves vregs.
    x = x_ref[...]                                                    # (tile, D)
    h = jnp.dot(x, w1_ref[...], preferred_element_type=jnp.float32)  # MXU, f32 acc
    h = h + b1_ref[...]                                               # (tile, H_pad), f32
    h = jnp.where(h > 0, h, jnp.float32(0.01) * h)                    # LeakyReLU (torch default)
    h = h.astype(w2_ref.dtype)                                        # bf16 feed if requested
    y = jnp.dot(h, w2_ref[...], preferred_element_type=jnp.float32)  # MXU, f32 acc
    y = y + b2_ref[...]                                               # (tile, O_pad)
    o_ref[...] = y.astype(o_ref.dtype)


@functools.partial(jax.jit, static_argnames=("block_batch", "matmul_dtype"))
def mlp_forward(x, w1, b1, w2, b2, *, block_batch=512, matmul_dtype=None):
    B, D = x.shape
    H = w1.shape[1]
    O = w2.shape[1]
    out_dtype = x.dtype

    # ---- lane-dense hidden: pad hidden features to a multiple of 128 --------------------
    # Zero pad on W1 columns / b1 -> padded hidden columns are exactly 0 (LeakyReLU(0)=0),
    # zero pad on W2 rows -> padded hidden contributes nothing to the output.
    H_pad = int(_round_up(max(H, 128), 128))
    if H_pad != H:
        w1 = jnp.pad(w1, ((0, 0), (0, H_pad - H)))
        b1 = jnp.pad(b1, ((0, 0), (0, H_pad - H)))
        w2 = jnp.pad(w2, ((0, H_pad - H), (0, 0)))

    # ---- lane-dense output: pad output features to a multiple of 128 --------------------
    O_pad = int(_round_up(max(O, 128), 128))
    if O_pad != O:
        w2 = jnp.pad(w2, ((0, 0), (0, O_pad - O)))
        b2 = jnp.pad(b2, ((0, 0), (0, O_pad - O)))

    # ---- optional low-precision MXU operands (accumulation stays f32) -------------------
    if matmul_dtype is not None:
        x = x.astype(matmul_dtype)
        w1 = w1.astype(matmul_dtype)
        w2 = w2.astype(matmul_dtype)
    b1 = b1.astype(jnp.float32)
    b2 = b2.astype(jnp.float32)

    # ---- batch tiling: big tiles, ragged batch handled by wrapper padding ---------------
    sublane = {4: 8, 2: 16, 1: 32}[jnp.dtype(x.dtype).itemsize]
    tile = int(_round_up(min(block_batch, int(_round_up(B, sublane))), sublane))
    B_pad = int(_round_up(B, tile))
    if B_pad != B:
        x = jnp.pad(x, ((0, B_pad - B), (0, 0)))
    grid = (B_pad // tile,)

    # ---- VMEM budget: double-buffered x/out tiles + resident weights/biases -------------
    x_isz = jnp.dtype(x.dtype).itemsize
    w_isz = jnp.dtype(w1.dtype).itemsize
    o_isz = jnp.dtype(out_dtype).itemsize
    need = (2 * tile * D * x_isz                     # x tile, double-buffered
            + 2 * tile * O_pad * o_isz               # out tile, double-buffered
            + 2 * (D * H_pad + H_pad * O_pad) * w_isz  # weights (constant index_map)
            + 2 * (H_pad + O_pad) * 4)               # biases (f32)
    vmem_limit = int(min(max(need + (8 << 20), 32 << 20), 112 << 20))

    out = pl.pallas_call(
        _mlp_kernel,
        out_shape=jax.ShapeDtypeStruct((B_pad, O_pad), out_dtype),
        grid_spec=pltpu.PrefetchScalarGridSpec(
            num_scalar_prefetch=0,
            grid=grid,
            in_specs=[
                pl.BlockSpec((tile, D), lambda i: (i, 0)),       # x tile
                pl.BlockSpec((D, H_pad), lambda i: (0, 0)),      # W1 (resident, lane-padded)
                pl.BlockSpec((1, H_pad), lambda i: (0, 0)),      # b1
                pl.BlockSpec((H_pad, O_pad), lambda i: (0, 0)),  # W2 (resident, lane-padded)
                pl.BlockSpec((1, O_pad), lambda i: (0, 0)),      # b2
            ],
            out_specs=pl.BlockSpec((tile, O_pad), lambda i: (i, 0)),
        ),
        compiler_params=pltpu.CompilerParams(
            dimension_semantics=("parallel",),
            vmem_limit_bytes=vmem_limit,
        ),
    )(x, w1, b1, w2, b2)

    return out[:B, :O]


def init_params(key, input_dim, output_dim, dtype=jnp.float32):
    """Deterministic init mimicking nn.Linear's uniform(-1/sqrt(fan_in), 1/sqrt(fan_in))."""
    hidden = input_dim // 2
    k1, k2, k3, k4 = jax.random.split(key, 4)
    bound1 = 1.0 / (input_dim ** 0.5)
    bound2 = 1.0 / (hidden ** 0.5)
    # Stored as (in, out) — transpose of PyTorch's (out, in).
    w1 = jax.random.uniform(k1, (input_dim, hidden), dtype, -bound1, bound1)
    b1 = jax.random.uniform(k2, (1, hidden), dtype, -bound1, bound1)
    w2 = jax.random.uniform(k3, (hidden, output_dim), dtype, -bound2, bound2)
    b2 = jax.random.uniform(k4, (1, output_dim), dtype, -bound2, bound2)
    return w1, b1, w2, b2


def reference_mlp(x, w1, b1, w2, b2):
    h = x @ w1 + b1
    h = jnp.where(h > 0, h, 0.01 * h)
    return h @ w2 + b2


if __name__ == "__main__":
    key = jax.random.PRNGKey(0)
    kx, kp, kx2 = jax.random.split(key, 3)

    batch, input_dim, output_dim = 16, 32, 8
    x = jax.random.normal(kx, (batch, input_dim), jnp.float32)
    w1, b1, w2, b2 = init_params(kp, input_dim, output_dim)
    ref = reference_mlp(x, w1, b1, w2, b2)

    # f32 MXU path: exact parity with the reference.
    out = jax.block_until_ready(mlp_forward(x, w1, b1, w2, b2))
    assert out.shape == (batch, output_dim)
    assert jnp.allclose(out, ref, atol=1e-5, rtol=1e-5), "f32 mismatch vs reference"

    # bf16 MXU operands (f32 accumulation): looser tolerance per bf16 mantissa.
    out_bf16 = jax.block_until_ready(
        mlp_forward(x, w1, b1, w2, b2, matmul_dtype=jnp.bfloat16))
    assert out_bf16.shape == (batch, output_dim)
    assert jnp.allclose(out_bf16, ref, atol=5e-2, rtol=5e-2), "bf16 mismatch vs reference"

    # Ragged batch exercises the wrapper padding path (no divisibility assert).
    batch2 = 13
    x2 = jax.random.normal(kx2, (batch2, input_dim), jnp.float32)
    ref2 = reference_mlp(x2, w1, b1, w2, b2)
    out2 = jax.block_until_ready(mlp_forward(x2, w1, b1, w2, b2, block_batch=256))
    assert out2.shape == (batch2, output_dim)
    assert jnp.allclose(out2, ref2, atol=1e-5, rtol=1e-5), "ragged-batch mismatch vs reference"

    print("KERNEL_OK")
</pallas_src>

<mosaic_0001>
module attributes {stable_mosaic.version = 11 : i64} {
  func.func @_mlp_kernel(%arg0: i32, %arg1: memref<16x32xf32, #tpu.memory_space<vmem>>, %arg2: memref<32x128xf32, #tpu.memory_space<vmem>>, %arg3: memref<1x128xf32, #tpu.memory_space<vmem>>, %arg4: memref<128x128xf32, #tpu.memory_space<vmem>>, %arg5: memref<1x128xf32, #tpu.memory_space<vmem>>, %arg6: memref<16x128xf32, #tpu.memory_space<vmem>>) attributes {dimension_semantics = [#tpu.dimension_semantics<parallel>], iteration_bounds = array<i64: 1>, scalar_prefetch = 0 : i64, scratch_operands = 0 : i64, tpu.core_type = #tpu.core_type<tc>, window_params = [{transform_indices = @transform_0, window_bounds = array<i64: 16, 32>}, {pipeline_mode = #tpu.pipeline_mode<synchronous>, transform_indices = @transform_1, window_bounds = array<i64: 32, 128>}, {pipeline_mode = #tpu.pipeline_mode<synchronous>, transform_indices = @transform_2, window_bounds = array<i64: 1, 128>}, {pipeline_mode = #tpu.pipeline_mode<synchronous>, transform_indices = @transform_3, window_bounds = array<i64: 128, 128>}, {pipeline_mode = #tpu.pipeline_mode<synchronous>, transform_indices = @transform_4, window_bounds = array<i64: 1, 128>}, {transform_indices = @transform_5, window_bounds = array<i64: 16, 128>}]} {
    %c0 = arith.constant 0 : index
    %c0_0 = arith.constant 0 : index
    %0 = vector.load %arg1[%c0, %c0_0] : memref<16x32xf32, #tpu.memory_space<vmem>>, vector<16x32xf32>
    %c0_1 = arith.constant 0 : index
    %c0_2 = arith.constant 0 : index
    %1 = vector.load %arg2[%c0_1, %c0_2] : memref<32x128xf32, #tpu.memory_space<vmem>>, vector<32x128xf32>
    %cst = arith.constant dense<0.000000e+00> : vector<16x128xf32>
    %2 = tpu.matmul %0, %1, %cst {dimension_numbers = #tpu.dot_dimension_numbers<[1], [0], [0], [1], [0, 0, 1, 1], [], []>} : vector<16x32xf32>, vector<32x128xf32>, vector<16x128xf32> -> vector<16x128xf32>
    %c0_3 = arith.constant 0 : index
    %c0_4 = arith.constant 0 : index
    %3 = vector.load %arg3[%c0_3, %c0_4] : memref<1x128xf32, #tpu.memory_space<vmem>>, vector<1x128xf32>
    %4 = vector.broadcast %3 : vector<1x128xf32> to vector<16x128xf32>
    %5 = arith.addf %2, %4 : vector<16x128xf32>
    %cst_5 = arith.constant 0.000000e+00 : f32
    %6 = vector.broadcast %cst_5 : f32 to vector<16x128xf32>
    %7 = arith.cmpf ogt, %5, %6 : vector<16x128xf32>
    %cst_6 = arith.constant 0.00999999977 : f32
    %8 = vector.broadcast %cst_6 : f32 to vector<16x128xf32>
    %9 = arith.mulf %8, %5 : vector<16x128xf32>
    %10 = arith.select %7, %5, %9 : vector<16x128xi1>, vector<16x128xf32>
    %c0_7 = arith.constant 0 : index
    %c0_8 = arith.constant 0 : index
    %11 = vector.load %arg4[%c0_7, %c0_8] : memref<128x128xf32, #tpu.memory_space<vmem>>, vector<128x128xf32>
    %cst_9 = arith.constant dense<0.000000e+00> : vector<16x128xf32>
    %12 = tpu.matmul %10, %11, %cst_9 {dimension_numbers = #tpu.dot_dimension_numbers<[1], [0], [0], [1], [0, 0, 1, 1], [], []>} : vector<16x128xf32>, vector<128x128xf32>, vector<16x128xf32> -> vector<16x128xf32>
    %c0_10 = arith.constant 0 : index
    %c0_11 = arith.constant 0 : index
    %13 = vector.load %arg5[%c0_10, %c0_11] : memref<1x128xf32, #tpu.memory_space<vmem>>, vector<1x128xf32>
    %14 = vector.broadcast %13 : vector<1x128xf32> to vector<16x128xf32>
    %15 = arith.addf %12, %14 : vector<16x128xf32>
    %c0_12 = arith.constant 0 : index
    %c0_13 = arith.constant 0 : index
    %16 = vector.load %arg6[%c0_12, %c0_13] : memref<16x128xf32, #tpu.memory_space<vmem>>, vector<16x128xf32>
    tpu.vector_store %arg6[%c0_12, %c0_13], %15 {strides = array<i32>} : memref<16x128xf32, #tpu.memory_space<vmem>>, vector<16x128xf32>,
    return
  }
  func.func @transform_0(%arg0: i32) -> (i32, i32) {
    %c0_i32 = arith.constant 0 : i32
    %c0_i32_0 = arith.constant 0 : i32
    return %arg0, %c0_i32 : i32, i32
  }
  func.func @transform_1(%arg0: i32) -> (i32, i32) {
    %c0_i32 = arith.constant 0 : i32
    %c0_i32_0 = arith.constant 0 : i32
    %c0_i32_1 = arith.constant 0 : i32
    return %c0_i32, %c0_i32_0 : i32, i32
  }
  func.func @transform_2(%arg0: i32) -> (i32, i32) {
    %c0_i32 = arith.constant 0 : i32
    %c0_i32_0 = arith.constant 0 : i32
    %c0_i32_1 = arith.constant 0 : i32
    return %c0_i32, %c0_i32_0 : i32, i32
  }
  func.func @transform_3(%arg0: i32) -> (i32, i32) {
    %c0_i32 = arith.constant 0 : i32
    %c0_i32_0 = arith.constant 0 : i32
    %c0_i32_1 = arith.constant 0 : i32
    return %c0_i32, %c0_i32_0 : i32, i32
  }
  func.func @transform_4(%arg0: i32) -> (i32, i32) {
    %c0_i32 = arith.constant 0 : i32
    %c0_i32_0 = arith.constant 0 : i32
    %c0_i32_1 = arith.constant 0 : i32
    return %c0_i32, %c0_i32_0 : i32, i32
  }
  func.func @transform_5(%arg0: i32) -> (i32, i32) {
    %c0_i32 = arith.constant 0 : i32
    %c0_i32_0 = arith.constant 0 : i32
    return %arg0, %c0_i32 : i32, i32
  }
}

</mosaic_0001>

<bundles_post_ra>
// kernel: mlp_forward.1
= control target key start
LH: loop header
LB: loop body
LE: loop exit
PB: predicated region body
PF: predicated region fallthrough
CT: control target
= control target key end

     0   :  { %vm33_vm0 = vcmask 261120   ;;  %s409_s1 = inlined_call_operand.vmem [shape: f32[32,128], index: 1, kind: input, shape index: {}]   ;;  %s410_s0 = inlined_call_operand.vmem [shape: f32[16,32], index: 0, kind: input, shape index: {}]   ;;  %s411_s3 = inlined_call_operand.vmem [shape: f32[128,128], index: 3, kind: input, shape index: {}]   ;;  %s412_s2 = inlined_call_operand.vmem [shape: f32[1,128], index: 2, kind: input, shape index: {}]   ;;  %s413_s4 = inlined_call_operand.vmem [shape: f32[1,128], index: 4, kind: input, shape index: {}]   ;;  %s414_s5 = inlined_call_operand.vmem [shape: f32[16,128], index: 5, kind: output, shape index: {}]  }
   0x1   :  { %v25_v0 = vld [vmem:[%s409_s1 + $0x18] sm:$0xff]  ;;  %v24_v1 = vld [vmem:[%s409_s1 + $0x10] sm:$0xff]  ;;  %v20_v2 = vld [vmem:[%s410_s0] sm:$0xff] }
   0x2   :  { %253 = vmatprep.subr.mxu0 %v25_v0  ;;  %v23_v3 = vld [vmem:[%s409_s1 + $0x8] sm:$0xff]  ;;  %261 = vmatprep.mubr.msk.f32.mxu0 %vm33_vm0, %v20_v2  ;;  %v136_v4 = vld [vmem:[%s411_s3 + $0x78] sm:$0xff]  ;;  %v135_v5 = vld [vmem:[%s411_s3 + $0x70] sm:$0xff] }
   0x3   :  { %254 = vmatpush3.msra.mxu0 %v25_v0  ;;  %264 = vmatprep.subr.mxu1 %v136_v4  ;;  %v22_v6 = vld [vmem:[%s409_s1] sm:$0xff]  ;;  %v134_v7 = vld [vmem:[%s411_s3 + $0x68] sm:$0xff]  ;;  %v132_v10 = vld [vmem:[%s411_s3 + $0x58] sm:$0xff] }
   0x4   :  { %255 = vmatprep.subr.mxu0 %v24_v1  ;;  %265 = vmatpush3.msra.mxu1 %v136_v4  ;;  %v21_v8 = vld [vmem:[%s410_s0 + $0x8] sm:$0xff]  ;;  %v133_v9 = vld [vmem:[%s411_s3 + $0x60] sm:$0xff]  ;;  %v131_v11 = vld [vmem:[%s411_s3 + $0x50] sm:$0xff] }
   0x5   :  { %256 = vmatpush3.msra.mxu0 %v24_v1  ;;  %266 = vmatprep.subr.mxu1 %v135_v5  ;;  %v130_v12 = vld [vmem:[%s411_s3 + $0x48] sm:$0xff]  ;;  %v129_v13 = vld [vmem:[%s411_s3 + $0x40] sm:$0xff]  ;;  %v128_v14 = vld [vmem:[%s411_s3 + $0x38] sm:$0xff] }
   0x6   :  { %257 = vmatprep.subr.mxu0 %v23_v3  ;;  %267 = vmatpush3.msra.mxu1 %v135_v5  ;;  %v127_v15 = vld [vmem:[%s411_s3 + $0x30] sm:$0xff]  ;;  %v126_v16 = vld [vmem:[%s411_s3 + $0x28] sm:$0xff]  ;;  %v125_v17 = vld [vmem:[%s411_s3 + $0x20] sm:$0xff] }
   0x7   :  { %258 = vmatpush3.msra.mxu0 %v23_v3  ;;  %268 = vmatprep.subr.mxu1 %v134_v7  ;;  %v124_v18 = vld [vmem:[%s411_s3 + $0x18] sm:$0xff]  ;;  %v123_v19 = vld [vmem:[%s411_s3 + $0x10] sm:$0xff]  ;;  %v122_v20 = vld [vmem:[%s411_s3 + $0x8] sm:$0xff] }
   0x8   :  { %259 = vmatprep.subr.mxu0 %v22_v6  ;;  %269 = vmatpush3.msra.mxu1 %v134_v7  ;;  %v121_v21 = vld [vmem:[%s411_s3] sm:$0xff] }
   0x9   :  { %260 = vmatpush3.msra.mxu0 %v22_v6  ;;  %270 = vmatprep.subr.mxu1 %v133_v9  ;;  %v225_v22 = vld [vmem:[%s412_s2] ss:$0 sm:$0xff] }
   0xa   :  { %262 = vmatmul.mubr.msk.f32.vlgmr.msra.gmra.mxu0 %vm33_vm0, %v21_v8  ;;  %271 = vmatpush3.msra.mxu1 %v133_v9  ;;  %v228_v31 = vld [vmem:[%s413_s4] ss:$0 sm:$0xff] }
   0xb   :  { %272 = vmatprep.subr.mxu1 %v132_v10 }
   0xc   :  { %273 = vmatpush3.msra.mxu1 %v132_v10 }
   0xd   :  { %274 = vmatprep.subr.mxu1 %v131_v11 }
   0xe   :  { %275 = vmatpush3.msra.mxu1 %v131_v11 }
   0xf   :  { %276 = vmatprep.subr.mxu1 %v130_v12 }
  0x10   :  { %277 = vmatpush3.msra.mxu1 %v130_v12 }
  0x11   :  { %278 = vmatprep.subr.mxu1 %v129_v13 }
  0x12   :  { %279 = vmatpush3.msra.mxu1 %v129_v13 }
  0x13   :  { %280 = vmatprep.subr.mxu1 %v128_v14 }
  0x14   :  { %281 = vmatpush3.msra.mxu1 %v128_v14 }
  0x15   :  { %282 = vmatprep.subr.mxu1 %v127_v15 }
  0x16   :  { %283 = vmatpush3.msra.mxu1 %v127_v15 }
  0x17   :  { %284 = vmatprep.subr.mxu1 %v126_v16 }
  0x18   :  { %285 = vmatpush3.msra.mxu1 %v126_v16 }
  0x19   :  { %286 = vmatprep.subr.mxu1 %v125_v17 }
  0x1a   :  { %287 = vmatpush3.msra.mxu1 %v125_v17 }
  0x1b   :  { %288 = vmatprep.subr.mxu1 %v124_v18 }
  0x1c   :  { %289 = vmatpush3.msra.mxu1 %v124_v18 }
  0x1d   :  { %290 = vmatprep.subr.mxu1 %v123_v19 }
  0x1e   :  { %291 = vmatpush3.msra.mxu1 %v123_v19 }
  0x1f   :  { %292 = vmatprep.subr.mxu1 %v122_v20 }
  0x20   :  { %293 = vmatpush3.msra.mxu1 %v122_v20 }
  0x21   :  { %294 = vmatprep.subr.mxu1 %v121_v21 }
  0x22   :  { %295 = vmatpush3.msra.mxu1 %v121_v21 }
  0xca   :  { %v263_v23 = vpop.f32.mrf.mxu0 }
  0xcb   :  { %v112_v24 = vadd.f32 %v263_v23, %v225_v22 }
  0xcc   :  { %v106_v25 = vpop.f32.mrf.mxu0 }
  0xcd   :  { %v107_v26 = vadd.f32 %v225_v22, %v106_v25  ;;  %v118_v27 = vmul.f32 0.01, %v112_v24  ;;  %vm116_vm2 = vcmp.gt.f32.partialorder %v112_v24, 0.0 }
  0xcf   :  { %vm115_vm1 = vcmp.gt.f32.partialorder %v107_v26, 0.0  ;;  %v117_v28 = vmul.f32 0.01, %v107_v26  ;;  %v120_v30 = vsel %vm116_vm2, %v112_v24, %v118_v27 }
  0xd1   :  { %v119_v29 = vsel %vm115_vm1, %v107_v26, %v117_v28 }
  0xd2   :  { %296 = vmatprep.mubr.f32.mxu1 %v119_v29 }
  0xd3   :  { %297 = vmatmul.mubr.f32.vlgmr.msra.gmra.mxu1 %v120_v30 }
 0x193   :  { %v298_v32 = vpop.f32.mrf.mxu1 }
 0x194   :  { %v216_v33 = vadd.f32 %v298_v32, %v228_v31 }
 0x195   :  { %v210_v34 = vpop.f32.mrf.mxu1 }
 0x196   :  { %220 = vst [vmem:[%s414_s5 + $0x8] sm:$0xff] %v216_v33  ;;  %v211_v35 = vadd.f32 %v228_v31, %v210_v34 }
 0x198   :  { %219 = vst [vmem:[%s414_s5] sm:$0xff] %v211_v35 }

</bundles_post_ra>
